<compile_context>
chip_gen: v7x
topology: tpu7x:2x2x1
jax: 0.10.0
libtpu: 0.0.40
codegen_flags: <defaults>
</compile_context>

<pallas_src>
import functools

import jax
import jax.numpy as jnp
from jax.experimental import pallas as pl
from jax.experimental.pallas import tpu as pltpu


# ------------------------------------------------------------------- kernel --

def _fused_gin_forward_kernel(a_ref, h_ref, w_ref, pw_ref, b_ref, o_ref, *,
                              n_layers, layer_dims, w_offsets, residual_flags,
                              n_classes):
    """Whole GINNet forward, grid=().

    a_ref : [N, N]   bf16, A_hat = A + (1+eps) * I (combine folded in)
    h_ref : [N, in]  f32 node features
    w_ref : [R, hid] f32 MLP weight slab (per-layer W1, W2 stacked by rows)
    pw_ref: [in + L*hid, C] f32 fused prediction-head weight
    b_ref : [2L+1, max(hid, C)] f32 bias slab (per-layer b1, b2; last row = sum
            of prediction biases, zero-padded to the slab width)
    o_ref : [N, C]   f32 score
    """
    A = a_ref[...].astype(jnp.float32)    # exact upcast (0/1 values)
    h = h_ref[...]                        # [N, in_dim]
    B = b_ref[...]                        # [2L+1, bias_width] — one tiny load

    reps = [h]                            # hidden_rep[0] = raw input features

    for l in range(n_layers):
        din, dout = layer_dims[l]
        w1_off, w2_off = w_offsets[l]
        h_in = h

        # z = (1+eps)*h + sum_j A[i,j] h[j]  ==  A_hat @ h   (combine rides the MXU)
        z = jnp.dot(A, h, preferred_element_type=jnp.float32)

        # MLP layer 1: Linear (+ folded BN) -> ReLU
        x = jnp.dot(z, w_ref[pl.ds(w1_off, din), :],
                    preferred_element_type=jnp.float32) + B[2 * l:2 * l + 1, :dout]
        x = jnp.maximum(x, 0.0)
        # MLP layer 2: Linear (+ folded layer-level BN)
        x = jnp.dot(x, w_ref[pl.ds(w2_off, dout), :],
                    preferred_element_type=jnp.float32) + B[2 * l + 1:2 * l + 2, :dout]
        # GINLayer epilogue: activation, then residual; dropout = identity (eval)
        x = jnp.maximum(x, 0.0)
        if residual_flags[l]:
            x = x + h_in
        h = x
        reps.append(h)

    # Fused prediction heads: one K = (in + L*hid) matmul instead of L+1 tiny ones.
    rep = jnp.concatenate(reps, axis=-1)                       # [N, in + L*hid]
    score = jnp.dot(rep, pw_ref[...], preferred_element_type=jnp.float32)
    score = score + B[2 * n_layers:2 * n_layers + 1, :n_classes]

    # TODO(synk): if this kernel is ever iterated over a batch grid, pad the class
    # dim to 128 lanes in the out BlockSpec for unmasked stores (noise here).
    o_ref[...] = score


def gin_net_forward(a_hat, h, fused):
    """a_hat: [N, N] (bf16) adjacency with (1+eps)*I folded in, h: [N, in] -> [N, C]."""
    N = a_hat.shape[0]
    C = fused["n_classes"]

    kernel = functools.partial(
        _fused_gin_forward_kernel,
        n_layers=fused["n_layers"],
        layer_dims=fused["layer_dims"],
        w_offsets=fused["w_offsets"],
        residual_flags=fused["residual"],
        n_classes=C,
    )
    vmem = pl.BlockSpec(memory_space=pltpu.MemorySpace.VMEM)
    return pl.pallas_call(
        kernel,
        out_shape=jax.ShapeDtypeStruct((N, C), jnp.float32),
        in_specs=[vmem] * 5,
        out_specs=vmem,
    )(a_hat, h.astype(jnp.float32), fused["w_slab"], fused["pred_w"],
      fused["bias_slab"])


# ----------------------------------------------------------- model (params) --

def _bn_params(dim):
    # PyTorch BatchNorm1d defaults: weight=1, bias=0, running_mean=0, running_var=1
    return {
        "gamma": jnp.ones((1, dim), jnp.float32),
        "beta": jnp.zeros((1, dim), jnp.float32),
        "mean": jnp.zeros((1, dim), jnp.float32),
        "var": jnp.ones((1, dim), jnp.float32),
    }


def init_gin_net_params(key, in_dim, hid_dim, n_classes, n_layers):
    """Deterministic synthetic init. Linear weights stored as [in, out]."""
    params = {"gin_layers": [], "pred": []}

    def lin(k, din, dout):
        kw, kb = jax.random.split(k)
        return {
            "W": 0.1 * jax.random.normal(kw, (din, dout), jnp.float32),
            "b": 0.1 * jax.random.normal(kb, (dout,), jnp.float32),
        }

    keys = jax.random.split(key, n_layers + (n_layers + 1))
    # GIN layers (MultiLinearLayer with mlp_layers=2: Lin->BN->ReLU->Lin)
    for li in range(n_layers):
        din = in_dim if li == 0 else hid_dim
        k1, k2 = jax.random.split(keys[li])
        params["gin_layers"].append({
            "eps": 0.0,                     # learn_eps=False -> eps = 0
            "mlp_lin1": lin(k1, din, hid_dim),
            "mlp_bn1": _bn_params(hid_dim),
            "mlp_lin2": lin(k2, hid_dim, hid_dim),
            "bn": _bn_params(hid_dim),
            "in_dim": din,
            "out_dim": hid_dim,
        })
    # prediction heads: one per hidden representation (n_layers + 1 of them)
    for pi in range(n_layers + 1):
        din = in_dim if pi == 0 else hid_dim
        params["pred"].append(lin(keys[n_layers + pi], din, n_classes))
    return params


def _fold_bn_into_linear(W, b, bn, bn_eps=1e-5):
    """Inference BN after a Linear is an affine map — fold it into W, b."""
    scale = (bn["gamma"] * jax.lax.rsqrt(bn["var"] + bn_eps)).reshape(1, -1)  # [1, D]
    Wf = (W * scale).astype(jnp.float32)                                       # [din, D]
    bf = ((b.reshape(1, -1) - bn["mean"]) * scale + bn["beta"]).astype(jnp.float32)
    return Wf, bf


def _pad_row(row, width):
    row = jnp.asarray(row, jnp.float32).reshape(1, -1)
    d = row.shape[1]
    if d < width:
        row = jnp.pad(row, ((0, 0), (0, width - d)))
    return row


def prepare_fused_params(params):
    """Fold BN, pack all weights/biases into 3 slabs, emit static slice offsets."""
    n_layers = len(params["gin_layers"])
    hid_dim = params["gin_layers"][0]["out_dim"]
    n_classes = params["pred"][0]["W"].shape[1]
    bias_width = max(hid_dim, n_classes)

    eps_vals = [float(lp["eps"]) for lp in params["gin_layers"]]
    # learn_eps=False -> eps identical (0) across layers, so the (1+eps)*I fold is shared.
    assert all(e == eps_vals[0] for e in eps_vals)

    w_blocks, bias_rows = [], []
    w_offsets, layer_dims, res_flags = [], [], []
    off = 0
    for lp in params["gin_layers"]:
        W1, b1 = _fold_bn_into_linear(lp["mlp_lin1"]["W"], lp["mlp_lin1"]["b"],
                                      lp["mlp_bn1"])
        W2, b2 = _fold_bn_into_linear(lp["mlp_lin2"]["W"], lp["mlp_lin2"]["b"],
                                      lp["bn"])
        din, dout = lp["in_dim"], lp["out_dim"]
        w_blocks += [W1, W2]
        w_offsets.append((off, off + din))
        off += din + dout
        layer_dims.append((din, dout))
        res_flags.append(din == dout)        # residual only when dims match
        bias_rows.append(_pad_row(b1, bias_width))
        bias_rows.append(_pad_row(b2, bias_width))

    # Fused prediction head: stack weights by rows, sum the biases.
    pred_w = jnp.concatenate(
        [p["W"].astype(jnp.float32) for p in params["pred"]], axis=0)   # [in+L*hid, C]
    pred_b = sum(p["b"].astype(jnp.float32) for p in params["pred"])    # [C]
    bias_rows.append(_pad_row(pred_b, bias_width))

    return {
        "w_slab": jnp.concatenate(w_blocks, axis=0).astype(jnp.float32),
        "pred_w": pred_w,
        "bias_slab": jnp.concatenate(bias_rows, axis=0).astype(jnp.float32),
        "w_offsets": tuple(w_offsets),
        "layer_dims": tuple(layer_dims),
        "residual": tuple(res_flags),
        "n_layers": n_layers,
        "n_classes": n_classes,
        "eps": eps_vals[0],
        "hid_dim": hid_dim,
    }


def fold_adjacency(adj, eps):
    """A_hat = A + (1+eps)*I, cast to bf16 (values here are exact in bf16)."""
    n = adj.shape[0]
    a_hat = adj.astype(jnp.float32) + (1.0 + eps) * jnp.eye(n, dtype=jnp.float32)
    return a_hat.astype(jnp.bfloat16)


# --------------------------------------------------------------------- main --

if __name__ == "__main__":
    # net_params: in_dim=16, hidden_dim=32, n_classes=8, L=2, mlp_layers=2,
    # neighbor_pool='sum', residual=True, batch_norm=True, activation=relu,
    # bias=True, learn_eps=False, dropout=0 (eval).
    N_NODES, IN_DIM, HID_DIM, N_CLASSES, N_LAYERS = 64, 16, 32, 8, 2

    key = jax.random.PRNGKey(0)
    k_adj, k_feat, k_par = jax.random.split(key, 3)

    # random undirected graph as dense adjacency (no self loops; GIN's (1+eps)*h
    # self-term is folded into A_hat below)
    adj = (jax.random.uniform(k_adj, (N_NODES, N_NODES)) < 0.1).astype(jnp.float32)
    adj = jnp.maximum(adj, adj.T)
    adj = adj * (1.0 - jnp.eye(N_NODES, dtype=jnp.float32))

    h0 = jax.random.normal(k_feat, (N_NODES, IN_DIM), jnp.float32)
    params = init_gin_net_params(k_par, IN_DIM, HID_DIM, N_CLASSES, N_LAYERS)
    fused = prepare_fused_params(params)
    a_hat = fold_adjacency(adj, fused["eps"])

    # TODO(synk): DGL graph object / edge features `e` are unused by this forward;
    # the graph is represented by the dense adjacency matrix instead.
    fwd = jax.jit(lambda A, h: gin_net_forward(A, h, fused))
    scores = fwd(a_hat, h0)
    jax.block_until_ready(scores)

    assert scores.shape == (N_NODES, N_CLASSES)
    assert bool(jnp.all(jnp.isfinite(scores)))
    print("KERNEL_OK")
</pallas_src>

<mosaic_0001>
module attributes {stable_mosaic.version = 11 : i64} {
  func.func @_fused_gin_forward_kernel(%arg0: memref<64x64xbf16, #tpu.memory_space<vmem>>, %arg1: memref<64x16xf32, #tpu.memory_space<vmem>>, %arg2: memref<112x32xf32, #tpu.memory_space<vmem>>, %arg3: memref<80x8xf32, #tpu.memory_space<vmem>>, %arg4: memref<5x32xf32, #tpu.memory_space<vmem>>, %arg5: memref<64x8xf32, #tpu.memory_space<vmem>>) attributes {dimension_semantics = [], scalar_prefetch = 0 : i64, scratch_operands = 0 : i64, tpu.core_type = #tpu.core_type<tc>} {
    %c0 = arith.constant 0 : index
    %c0_0 = arith.constant 0 : index
    %0 = vector.load %arg0[%c0, %c0_0] : memref<64x64xbf16, #tpu.memory_space<vmem>>, vector<64x64xbf16>
    %1 = arith.extf %0 : vector<64x64xbf16> to vector<64x64xf32>
    %c0_1 = arith.constant 0 : index
    %c0_2 = arith.constant 0 : index
    %2 = vector.load %arg1[%c0_1, %c0_2] : memref<64x16xf32, #tpu.memory_space<vmem>>, vector<64x16xf32>
    %c0_3 = arith.constant 0 : index
    %c0_4 = arith.constant 0 : index
    %3 = vector.load %arg4[%c0_3, %c0_4] : memref<5x32xf32, #tpu.memory_space<vmem>>, vector<5x32xf32>
    %cst = arith.constant dense<0.000000e+00> : vector<64x16xf32>
    %4 = tpu.matmul %1, %2, %cst {dimension_numbers = #tpu.dot_dimension_numbers<[1], [0], [0], [1], [0, 0, 1, 1], [], []>} : vector<64x64xf32>, vector<64x16xf32>, vector<64x16xf32> -> vector<64x16xf32>
    %c0_5 = arith.constant 0 : index
    %c0_6 = arith.constant 0 : index
    %5 = vector.load %arg2[%c0_5, %c0_6] : memref<112x32xf32, #tpu.memory_space<vmem>>, vector<16x32xf32>
    %cst_7 = arith.constant dense<0.000000e+00> : vector<64x32xf32>
    %6 = tpu.matmul %4, %5, %cst_7 {dimension_numbers = #tpu.dot_dimension_numbers<[1], [0], [0], [1], [0, 0, 1, 1], [], []>} : vector<64x16xf32>, vector<16x32xf32>, vector<64x32xf32> -> vector<64x32xf32>
    %7 = vector.extract_strided_slice %3 {offsets = [0, 0], sizes = [1, 32], strides = [1, 1]} : vector<5x32xf32> to vector<1x32xf32>
    %8 = vector.broadcast %7 : vector<1x32xf32> to vector<64x32xf32>
    %9 = arith.addf %6, %8 : vector<64x32xf32>
    %cst_8 = arith.constant 0.000000e+00 : f32
    %10 = vector.broadcast %cst_8 : f32 to vector<64x32xf32>
    %11 = arith.maximumf %9, %10 : vector<64x32xf32>
    %c16 = arith.constant 16 : index
    %c0_9 = arith.constant 0 : index
    %12 = vector.load %arg2[%c16, %c0_9] : memref<112x32xf32, #tpu.memory_space<vmem>>, vector<32x32xf32>
    %cst_10 = arith.constant dense<0.000000e+00> : vector<64x32xf32>
    %13 = tpu.matmul %11, %12, %cst_10 {dimension_numbers = #tpu.dot_dimension_numbers<[1], [0], [0], [1], [0, 0, 1, 1], [], []>} : vector<64x32xf32>, vector<32x32xf32>, vector<64x32xf32> -> vector<64x32xf32>
    %14 = vector.extract_strided_slice %3 {offsets = [1, 0], sizes = [1, 32], strides = [1, 1]} : vector<5x32xf32> to vector<1x32xf32>
    %15 = vector.broadcast %14 : vector<1x32xf32> to vector<64x32xf32>
    %16 = arith.addf %13, %15 : vector<64x32xf32>
    %cst_11 = arith.constant 0.000000e+00 : f32
    %17 = vector.broadcast %cst_11 : f32 to vector<64x32xf32>
    %18 = arith.maximumf %16, %17 : vector<64x32xf32>
    %cst_12 = arith.constant dense<0.000000e+00> : vector<64x32xf32>
    %19 = tpu.matmul %1, %18, %cst_12 {dimension_numbers = #tpu.dot_dimension_numbers<[1], [0], [0], [1], [0, 0, 1, 1], [], []>} : vector<64x64xf32>, vector<64x32xf32>, vector<64x32xf32> -> vector<64x32xf32>
    %c48 = arith.constant 48 : index
    %c0_13 = arith.constant 0 : index
    %20 = vector.load %arg2[%c48, %c0_13] : memref<112x32xf32, #tpu.memory_space<vmem>>, vector<32x32xf32>
    %cst_14 = arith.constant dense<0.000000e+00> : vector<64x32xf32>
    %21 = tpu.matmul %19, %20, %cst_14 {dimension_numbers = #tpu.dot_dimension_numbers<[1], [0], [0], [1], [0, 0, 1, 1], [], []>} : vector<64x32xf32>, vector<32x32xf32>, vector<64x32xf32> -> vector<64x32xf32>
    %22 = vector.extract_strided_slice %3 {offsets = [2, 0], sizes = [1, 32], strides = [1, 1]} : vector<5x32xf32> to vector<1x32xf32>
    %23 = vector.broadcast %22 : vector<1x32xf32> to vector<64x32xf32>
    %24 = arith.addf %21, %23 : vector<64x32xf32>
    %cst_15 = arith.constant 0.000000e+00 : f32
    %25 = vector.broadcast %cst_15 : f32 to vector<64x32xf32>
    %26 = arith.maximumf %24, %25 : vector<64x32xf32>
    %c80 = arith.constant 80 : index
    %c0_16 = arith.constant 0 : index
    %27 = vector.load %arg2[%c80, %c0_16] : memref<112x32xf32, #tpu.memory_space<vmem>>, vector<32x32xf32>
    %cst_17 = arith.constant dense<0.000000e+00> : vector<64x32xf32>
    %28 = tpu.matmul %26, %27, %cst_17 {dimension_numbers = #tpu.dot_dimension_numbers<[1], [0], [0], [1], [0, 0, 1, 1], [], []>} : vector<64x32xf32>, vector<32x32xf32>, vector<64x32xf32> -> vector<64x32xf32>
    %29 = vector.extract_strided_slice %3 {offsets = [3, 0], sizes = [1, 32], strides = [1, 1]} : vector<5x32xf32> to vector<1x32xf32>
    %30 = vector.broadcast %29 : vector<1x32xf32> to vector<64x32xf32>
    %31 = arith.addf %28, %30 : vector<64x32xf32>
    %cst_18 = arith.constant 0.000000e+00 : f32
    %32 = vector.broadcast %cst_18 : f32 to vector<64x32xf32>
    %33 = arith.maximumf %31, %32 : vector<64x32xf32>
    %34 = arith.addf %33, %18 : vector<64x32xf32>
    %35 = tpu.concatenate %2, %18, %34 in 1 : vector<64x16xf32>, vector<64x32xf32>, vector<64x32xf32> -> vector<64x80xf32>
    %c0_19 = arith.constant 0 : index
    %c0_20 = arith.constant 0 : index
    %36 = vector.load %arg3[%c0_19, %c0_20] : memref<80x8xf32, #tpu.memory_space<vmem>>, vector<80x8xf32>
    %cst_21 = arith.constant dense<0.000000e+00> : vector<64x8xf32>
    %37 = tpu.matmul %35, %36, %cst_21 {dimension_numbers = #tpu.dot_dimension_numbers<[1], [0], [0], [1], [0, 0, 1, 1], [], []>} : vector<64x80xf32>, vector<80x8xf32>, vector<64x8xf32> -> vector<64x8xf32>
    %38 = vector.extract_strided_slice %3 {offsets = [4, 0], sizes = [1, 8], strides = [1, 1]} : vector<5x32xf32> to vector<1x8xf32>
    %39 = vector.broadcast %38 : vector<1x8xf32> to vector<64x8xf32>
    %40 = arith.addf %37, %39 : vector<64x8xf32>
    %c0_22 = arith.constant 0 : index
    %c0_23 = arith.constant 0 : index
    %41 = vector.load %arg5[%c0_22, %c0_23] : memref<64x8xf32, #tpu.memory_space<vmem>>, vector<64x8xf32>
    tpu.vector_store %arg5[%c0_22, %c0_23], %40 {strides = array<i32>} : memref<64x8xf32, #tpu.memory_space<vmem>>, vector<64x8xf32>,
    return
  }
}

</mosaic_0001>

<bundles_post_ra>
// kernel: _lambda_.1
= control target key start
LH: loop header
LB: loop body
LE: loop exit
PB: predicated region body
PF: predicated region fallthrough
CT: control target
= control target key end

     0   :  { %10 = vsyncpa [#allocation3], 0  ;;  %s1976_s0 = inlined_call_operand.hbm [shape: bf16[64,64], index: 0, kind: input, shape index: {}]   ;;  %s1977_s1 = inlined_call_operand.vmem [shape: f32[64,16], index: 1, kind: input, shape index: {}]   ;;  %s1978_s2 = inlined_call_operand.hbm [shape: f32[112,32], index: 2, kind: input, shape index: {}]   ;;  %s1979_s3 = inlined_call_operand.vmem [shape: f32[80,8], index: 3, kind: input, shape index: {}]   ;;  %s1980_s4 = inlined_call_operand.vmem [shape: f32[5,32], index: 4, kind: input, shape index: {}]   ;;  %s1981_s5 = inlined_call_operand.vmem [shape: f32[64,8], index: 5, kind: output, shape index: {}]  }
   0x1   :  { %11 = vsyncpa [#allocation5], 0  ;;  %s1607_s18 = smov [#allocation2]   ;;  %s1559_s22 = scalar_lea.hbm %s1976_s0, 512 }
   0x2   :  { %s17_s19 = sshll.u32 %s1607_s18, 4  ;;  %p1560_p0 = scmp.ne.s32.totalorder %s1976_s0, %s1559_s22  ;;  %s18_s19 = int_to_ptr.vmem [resolvable:$true] %s17_s19 }
   0x3   :  { %p1563_p1 = scmp.lt.u32.totalorder %s1559_s22, %s1976_s0 }
   0x5   :  { %p1565_p2 = pnand %p1563_p1, %p1560_p0 }
   0x7   :  { %1568 = shalt.err (!%p1565_p2)
}
   0x8   :  { %s1569_s27 = scalar_lea.vmem %s18_s19, 512  ;;  %p1574_p4 = scmp.lt.s32.totalorder %s18_s19, %s18_s19 }
   0x9   :  { %p1570_p3 = scmp.ne.s32.totalorder %s18_s19, %s1569_s27  ;;  %p1575_p5 = scmp.lt.s32.totalorder %s1569_s27, %s1569_s27 }
   0xb   :  { %p1576_p6 = por %p1575_p5, %p1574_p4 }
   0xd   :  { %p1577_p7 = pnand %p1576_p6, %p1570_p3 }
   0xf   :  { %1580 = shalt.err (!%p1577_p7)
}
  0x10   :  { %s1608_s28 = smov 64   ;;  %s1609_s29 = smov 4  }
  0x11   :  { %23 = dma.hbm_to_vmem [thread:$0]  %s1976_s0, 512, %s18_s19, [#allocation3], %s1608_s28, %s1608_s28, %s1609_s29  }
  0x12   :  { %s1610_s7 = smov [#allocation4]   ;;  %s1581_s11 = scalar_lea.hbm %s1978_s2, 1792 }
  0x13   :  { %s31_s8 = sshll.u32 %s1610_s7, 4  ;;  %p1582_p8 = scmp.ne.s32.totalorder %s1978_s2, %s1581_s11  ;;  %s32_s8 = int_to_ptr.vmem [resolvable:$true] %s31_s8 }
  0x14   :  { %p1585_p9 = scmp.lt.u32.totalorder %s1581_s11, %s1978_s2 }
  0x16   :  { %p1587_p10 = pnand %p1585_p9, %p1582_p8 }
  0x18   :  { %1590 = shalt.err (!%p1587_p10)
}
  0x19   :  { %s1591_s16 = scalar_lea.vmem %s32_s8, 1792  ;;  %p1596_p12 = scmp.lt.s32.totalorder %s32_s8, %s32_s8 }
  0x1a   :  { %p1592_p11 = scmp.ne.s32.totalorder %s32_s8, %s1591_s16  ;;  %p1597_p13 = scmp.lt.s32.totalorder %s1591_s16, %s1591_s16 }
  0x1c   :  { %p1598_p0 = por %p1597_p13, %p1596_p12 }
  0x1e   :  { %p1599_p1 = pnand %p1598_p0, %p1592_p11 }
  0x20   :  { %1602 = shalt.err (!%p1599_p1)
}
  0x21   :  { %s1611_s0 = smov 128   ;;  %s1612_s17 = smov 8  }
  0x22   :  { %37 = dma.hbm_to_vmem [thread:$0]  %s1978_s2, 1792, %s32_s8, [#allocation5], %s1611_s0, %s1611_s0, %s1612_s17  }
  0x23   :  { %1603 = dma.done.wait [#allocation3], 512  }
  0x24   :  { %1604 = vsyncadd [#allocation3], 4294966784 }
  0x25   :  { %1605 = dma.done.wait [#allocation5], 1792  }
  0x26   :  { %1606 = vsyncadd [#allocation5], 4294965504  ;;  %v1672_v0 = vld [vmem:[%s1977_s1] sm:$0xff]  ;;  %v1677_v1 = vld [vmem:[%s1977_s1 + $0x8] sm:$0xff]  ;;  %vm73_vm0 = vcmask 523264   ;;  %vm209_vm1 = vcmask 130048   ;;  %v205_v41 = vlaneseq }
  0x27   :  { %v1682_v2 = vld [vmem:[%s1977_s1 + $0x10] sm:$0xff]  ;;  %v1471_v3 = vpack.c.bf16 %v1677_v1, %v1672_v0  ;;  %v1689_v4 = vld [vmem:[%s1977_s1 + $0x18] sm:$0xff]  ;;  %v1696_v6 = vld [vmem:[%s1977_s1 + $0x20] sm:$0xff]  ;;  %vm355_vm2 = vcmask 261120   ;;  %s1614_s29 = smov 48   ;;  %vm968_vm3 = vcmask 392192  }
  0x28   :  { %v1475_v5 = vpack.c.bf16 %v1689_v4, %v1682_v2  ;;  %v1701_v7 = vld [vmem:[%s1977_s1 + $0x28] sm:$0xff]  ;;  %v1703_v8 = vld [vmem:[#allocation2] sm:$0xff]   ;;  %v1712_v14 = vld [vmem:[%s1977_s1 + $0x30] sm:$0xff]  ;;  %v1764_v42 = vshrl.u32 %v205_v41, 7  ;;  %vm991_vm4 = vcmask 654336   ;;  %vm1121_vm5 = vcmask 64512  }
  0x29   :  { %1472 = vmatprep.subr.bf16.mxu0 %v1471_v3  ;;  %v1194_v9 = vunpack.c.l.bf16 %v1703_v8  ;;  %v203_v10 = vld [vmem:[#allocation4] sm:$0xff]  ;;  %v204_v11 = vld [vmem:[#allocation4 + $0x8] sm:$0xff]  ;;  %v1479_v12 = vpack.c.bf16 %v1701_v7, %v1696_v6  ;;  %v1717_v15 = vld [vmem:[%s1977_s1 + $0x38] sm:$0xff]  ;;  %v1195_v18 = vunpack.c.h.bf16 %v1703_v8 }
  0x2a   :  { %1474 = vmatpush3.bf16.msra.mxu0 %v1471_v3  ;;  %v1487_v13 = vpack.c.bf16 %v204_v11, %v203_v10  ;;  %v1483_v16 = vpack.c.bf16 %v1717_v15, %v1712_v14  ;;  %v1721_v17 = vld [vmem:[#allocation2 + $0x8] sm:$0xff]   ;;  %v1725_v20 = vld [vmem:[#allocation2 + $0x10] sm:$0xff]   ;;  %v1735_v23 = vld [vmem:[#allocation2 + $0x18] sm:$0xff]   ;;  %v207_v43 = vsub.s32 0, %v1764_v42 }
  0x2b   :  { %1476 = vmatprep.subr.bf16.mxu0 %v1475_v5  ;;  %1323 = vmatprep.mubr.msk.f32.mxu0 %vm73_vm0, %v1194_v9  ;;  %v1198_v19 = vunpack.c.l.bf16 %v1721_v17  ;;  %v1199_v21 = vunpack.c.h.bf16 %v1721_v17  ;;  %v1202_v22 = vunpack.c.l.bf16 %v1725_v20  ;;  %v1203_v24 = vunpack.c.h.bf16 %v1725_v20  ;;  %v347_v27 = vld [vmem:[#allocation4 + $0x10] sm:$0xff]  ;;  %v348_v28 = vld [vmem:[#allocation4 + $0x18] sm:$0xff]  ;;  %v349_v30 = vld [vmem:[#allocation4 + $0x20] sm:$0xff] }
  0x2c   :  { %1488 = vmatprep.subr.bf16.mxu1 %v1487_v13  ;;  %v1206_v25 = vunpack.c.l.bf16 %v1735_v23  ;;  %v1207_v26 = vunpack.c.h.bf16 %v1735_v23  ;;  %v1491_v29 = vpack.c.bf16 %v348_v28, %v347_v27  ;;  %v350_v31 = vld [vmem:[#allocation4 + $0x28] sm:$0xff]  ;;  %v1770_v44 = vld [vmem:[%s1980_s4] sm:$0x1f]  ;;  %s1613_s4 = smov 16   ;;  %v598_v41 = vld [vmem:[#allocation4 + $0x30] sm:$0xff] }
  0x2d   :  { %1490 = vmatpush3.bf16.msra.mxu1 %v1487_v13  ;;  %v1495_v34 = vpack.c.bf16 %v350_v31, %v349_v30  ;;  %v208_v45 = vrot.slane %v1770_v44, %v207_v43  ;;  %v353_v13 = vsub.s32 1, %v1764_v42  ;;  %v599_v43 = vld [vmem:[#allocation4 + $0x38] sm:$0xff]  ;;  %v743_v8 = vld [vmem:[#allocation4 + $0x50] sm:$0xff] }
  0x2e   :  { %1478 = vmatpush3.bf16.msra.mxu0 %v1475_v5  ;;  %1492 = vmatprep.subr.bf16.mxu1 %v1491_v29  ;;  %v744_v17 = vld [vmem:[#allocation4 + $0x58] sm:$0xff] }
  0x2f   :  { %1480 = vmatprep.subr.bf16.mxu0 %v1479_v12 }
  0x32   :  { %1482 = vmatpush3.bf16.msra.mxu0 %v1479_v12 }
  0x33   :  { %1484 = vmatprep.subr.bf16.mxu0 %v1483_v16 }
  0x36   :  { %1486 = vmatpush3.bf16.msra.mxu0 %v1483_v16  ;;  %v354_v16 = vrot.slane %v1770_v44, %v353_v13 }
  0x39   :  { %1324 = vmatmul.mubr.msk.f32.vlgmr.msra.gmra.mrb[0].mxu0 %vm73_vm0, %v1195_v18 }
  0x3a   :  { %1326 = vmatprep.mubr.msk.f32.mxu0 %vm73_vm0, %v1198_v19 }
  0x3d   :  { %1327 = vmatmul.mubr.msk.f32.gmra.mrb[2].mxu0 %vm73_vm0, %v1199_v21 }
  0x3e   :  { %1329 = vmatprep.mubr.msk.f32.mxu0 %vm73_vm0, %v1202_v22 }
  0x41   :  { %1330 = vmatmul.mubr.msk.f32.gmra.mrb[4].mxu0 %vm73_vm0, %v1203_v24 }
  0x42   :  { %1332 = vmatprep.mubr.msk.f32.mxu0 %vm73_vm0, %v1206_v25 }
  0x45   :  { %1333 = vmatmul.mubr.msk.f32.gmra.mrb[6].mxu0 %vm73_vm0, %v1207_v26 }
  0x46   :  { %1387 = vmatprep.mubr.msk.f32.mxu0 %vm73_vm0, %v1194_v9 }
 0x10c   :  { %v1325_v32 = vpop.f32.mrb[0].mxu0 }
 0x10d   :  { %v164_v33 = vpop.f32.mrb[1].mxu0 }
 0x10e   :  { %1339 = vmatprep.mubr.msk.f32.mxu1 %vm209_vm1, %v164_v33 }
 0x10f   :  { %1340 = vmatmul.mubr.msk.f32.vlgmr.msra.gmra.mrb[0].mxu1 %vm209_vm1, %v1325_v32 }
 0x110   :  { %v1328_v35 = vpop.f32.mrb[2].mxu0  ;;  %1494 = vmatpush3.bf16.msra.mxu1 %v1491_v29 }
 0x111   :  { %v174_v36 = vpop.f32.mrb[3].mxu0  ;;  %1496 = vmatprep.subr.bf16.mxu1 %v1495_v34 }
 0x112   :  { %1342 = vmatprep.mubr.msk.f32.mxu1 %vm209_vm1, %v174_v36 }
 0x113   :  { %1343 = vmatmul.mubr.msk.f32.gmra.mrb[2].mxu1 %vm209_vm1, %v1328_v35 }
 0x114   :  { %v1331_v37 = vpop.f32.mrb[4].mxu0  ;;  %1498 = vmatpush3.bf16.msra.mxu1 %v1495_v34 }
 0x115   :  { %v184_v38 = vpop.f32.mrb[5].mxu0 }
 0x116   :  { %1345 = vmatprep.mubr.msk.f32.mxu1 %vm209_vm1, %v184_v38 }
 0x117   :  { %1346 = vmatmul.mubr.msk.f32.gmra.mrb[4].mxu1 %vm209_vm1, %v1331_v37 }
 0x118   :  { %v1334_v39 = vpop.f32.mrb[6].mxu0 }
 0x119   :  { %v194_v40 = vpop.f32.mrb[7].mxu0 }
 0x11a   :  { %1348 = vmatprep.mubr.msk.f32.mxu1 %vm209_vm1, %v194_v40 }
 0x11b   :  { %1349 = vmatmul.mubr.msk.f32.gmra.mrb[6].mxu1 %vm209_vm1, %v1334_v39 }
 0x1e2   :  { %v1341_v46 = vpop.f32.mrb[0].mxu1 }
 0x1e3   :  { %v306_v47 = vadd.f32 %v1341_v46, %v208_v45  ;;  %v300_v48 = vpop.f32.mrb[1].mxu1 }
 0x1e4   :  { %v301_v49 = vadd.f32 %v300_v48, %v208_v45  ;;  %v1515_v48 = vpack.c.bf16 %v599_v43, %v598_v41 }
 0x1e5   :  { %v340_v52 = vmax.f32 %v306_v47, 0.0 }
 0x1e6   :  { %v339_v50 = vmax.f32 %v301_v49, 0.0  ;;  %v1344_v51 = vpop.f32.mrb[2].mxu1  ;;  %v601_v49 = vld [vmem:[#allocation4 + $0x48] sm:$0xff]  ;;  %1516 = vmatprep.subr.bf16.mxu1 %v1515_v48 }
 0x1e7   :  { %v316_v53 = vadd.f32 %v1344_v51, %v208_v45  ;;  %v310_v54 = vpop.f32.mrb[3].mxu1 }
 0x1e8   :  { %v311_v55 = vadd.f32 %v310_v54, %v208_v45  ;;  %1359 = vmatprep.mubr.msk.f32.mxu1 %vm355_vm2, %v339_v50 }
 0x1e9   :  { %1360 = vmatmul.mubr.msk.f32.vlgmr.msra.gmra.mrb[8].mxu1 %vm355_vm2, %v340_v52  ;;  %v342_v58 = vmax.f32 %v316_v53, 0.0 }
 0x1ea   :  { %v341_v56 = vmax.f32 %v311_v55, 0.0  ;;  %v1347_v57 = vpop.f32.mrb[4].mxu1  ;;  %1518 = vmatpush3.bf16.msra.mxu1 %v1515_v48 }
 0x1eb   :  { %v326_v59 = vadd.f32 %v1347_v57, %v208_v45  ;;  %v320_v60 = vpop.f32.mrb[5].mxu1 }
 0x1ec   :  { %v321_v61 = vadd.f32 %v320_v60, %v208_v45  ;;  %1362 = vmatprep.mubr.msk.f32.mxu1 %vm355_vm2, %v341_v56 }
 0x1ed   :  { %1363 = vmatmul.mubr.msk.f32.gmra.mrb[10].mxu1 %vm355_vm2, %v342_v58  ;;  %v344_v3 = vmax.f32 %v326_v59, 0.0 }
 0x1ee   :  { %v343_v62 = vmax.f32 %v321_v61, 0.0  ;;  %v1350_v63 = vpop.f32.mrb[6].mxu1 }
 0x1ef   :  { %v336_v5 = vadd.f32 %v1350_v63, %v208_v45  ;;  %v330_v9 = vpop.f32.mrb[7].mxu1 }
 0x1f0   :  { %v331_v10 = vadd.f32 %v330_v9, %v208_v45  ;;  %1365 = vmatprep.mubr.msk.f32.mxu1 %vm355_vm2, %v343_v62  ;;  %v600_v45 = vld [vmem:[#allocation4 + $0x40] sm:$0xff]  ;;  %v604_v9 = vsub.s32 2, %v1764_v42 }
 0x1f1   :  { %1366 = vmatmul.mubr.msk.f32.gmra.mrb[12].mxu1 %vm355_vm2, %v344_v3  ;;  %v346_v12 = vmax.f32 %v336_v5, 0.0  ;;  %v1519_v52 = vpack.c.bf16 %v601_v49, %v600_v45 }
 0x1f2   :  { %v345_v11 = vmax.f32 %v331_v10, 0.0  ;;  %v605_v10 = vrot.slane %v1770_v44, %v604_v9 }
 0x1f3   :  { %1520 = vmatprep.subr.bf16.mxu1 %v1519_v52 }
 0x1f4   :  { %1368 = vmatprep.mubr.msk.f32.mxu1 %vm355_vm2, %v345_v11  ;;  %1522 = vmatpush3.bf16.msra.mxu1 %v1519_v52 }
 0x1f5   :  { %1369 = vmatmul.mubr.msk.f32.gmra.mrb[14].mxu1 %vm355_vm2, %v346_v12 }
 0x2bc   :  { %v1361_v27 = vpop.f32.mrb[8].mxu1 }
 0x2bd   :  { %v452_v28 = vadd.f32 %v1361_v27, %v354_v16  ;;  %v446_v29 = vpop.f32.mrb[9].mxu1 }
 0x2be   :  { %v447_v30 = vadd.f32 %v446_v29, %v354_v16 }
 0x2bf   :  { %v1783_v31 = vmax.f32 %v452_v28, 0.0 }
 0x2c0   :  { %v1785_v32 = vmax.f32 %v447_v30, 0.0  ;;  %v1364_v33 = vpop.f32.mrb[10].mxu1 }
 0x2c1   :  { %v462_v34 = vadd.f32 %v1364_v33, %v354_v16  ;;  %906 = vrot.lane.b32.xlu0 %v1783_v31, %s1613_s4  ;;  %v456_v35 = vpop.f32.mrb[11].mxu1 }
 0x2c2   :  { %v457_v36 = vadd.f32 %v456_v35, %v354_v16  ;;  %v1499_v37 = vpack.c.bf16 %v1783_v31, %v1785_v32 }
 0x2c3   :  { %v1791_v38 = vmax.f32 %v462_v34, 0.0 }
 0x2c4   :  { %v1793_v39 = vmax.f32 %v457_v36, 0.0  ;;  %v1367_v40 = vpop.f32.mrb[12].mxu1  ;;  %1500 = vmatprep.subr.bf16.mxu0 %v1499_v37 }
 0x2c5   :  { %v472_v46 = vadd.f32 %v1367_v40, %v354_v16  ;;  %910 = vrot.lane.b32.xlu1 %v1791_v38, %s1613_s4  ;;  %v466_v47 = vpop.f32.mrb[13].mxu1  ;;  %904 = vrot.lane.b32.xlu0 %v1785_v32, %s1613_s4 }
 0x2c6   :  { %v467_v50 = vadd.f32 %v466_v47, %v354_v16  ;;  %1502 = vmatpush3.bf16.msra.mxu0 %v1499_v37  ;;  %v1503_v51 = vpack.c.bf16 %v1791_v38, %v1793_v39 }
 0x2c7   :  { %v1801_v53 = vmax.f32 %v472_v46, 0.0 }
 0x2c8   :  { %v1803_v54 = vmax.f32 %v467_v50, 0.0  ;;  %v1370_v55 = vpop.f32.mrb[14].mxu1  ;;  %1504 = vmatprep.subr.bf16.mxu0 %v1503_v51 }
 0x2c9   :  { %v482_v56 = vadd.f32 %v1370_v55, %v354_v16  ;;  %914 = vrot.lane.b32.xlu1 %v1801_v53, %s1613_s4  ;;  %908 = vrot.lane.b32.xlu0 %v1793_v39, %s1613_s4  ;;  %v476_v57 = vpop.f32.mrb[15].mxu1  ;;  %v977_v55 = vld [vmem:[%s1979_s3] sm:$0xff] }
 0x2ca   :  { %v477_v58 = vadd.f32 %v476_v57, %v354_v16  ;;  %1506 = vmatpush3.bf16.msra.mxu0 %v1503_v51  ;;  %v1507_v59 = vpack.c.bf16 %v1801_v53, %v1803_v54  ;;  %v979_v57 = vld [vmem:[%s1979_s3 + $0x10] sm:$0xff] }
 0x2cb   :  { %v1811_v60 = vmax.f32 %v482_v56, 0.0  ;;  %v978_v56 = vld [vmem:[%s1979_s3 + $0x8] sm:$0xff] }
 0x2cc   :  { %v1813_v61 = vmax.f32 %v477_v58, 0.0  ;;  %1508 = vmatprep.subr.bf16.mxu0 %v1507_v59  ;;  %v1531_v58 = vpack.c.bf16 %v978_v56, %v977_v55 }
 0x2cd   :  { %912 = vrot.lane.b32.xlu0 %v1803_v54, %s1613_s4 }
 0x2ce   :  { %1510 = vmatpush3.bf16.msra.mxu0 %v1507_v59  ;;  %v1511_v62 = vpack.c.bf16 %v1811_v60, %v1813_v61  ;;  %v980_v59 = vld [vmem:[%s1979_s3 + $0x18] sm:$0xff]  ;;  %1532 = vmatprep.subr.bf16.mxu1 %v1531_v58 }
 0x2d0   :  { %1512 = vmatprep.subr.bf16.mxu0 %v1511_v62 }
 0x2d1   :  { %916 = vrot.lane.b32.xlu0 %v1813_v61, %s1613_s4 }
 0x2d2   :  { %1514 = vmatpush3.bf16.msra.mxu0 %v1511_v62  ;;  %v1535_v62 = vpack.c.bf16 %v980_v59, %v979_v57 }
 0x2d5   :  { %1388 = vmatmul.mubr.msk.f32.vlgmr.msra.gmra.mrb[8].mxu0 %vm73_vm0, %v1195_v18  ;;  %v745_v18 = vld [vmem:[#allocation4 + $0x60] sm:$0xff] }
 0x2d6   :  { %1390 = vmatprep.mubr.msk.f32.mxu0 %vm73_vm0, %v1198_v19  ;;  %v1523_v19 = vpack.c.bf16 %v744_v17, %v743_v8  ;;  %v981_v8 = vld [vmem:[%s1979_s3 + $0x20] sm:$0xff]  ;;  %v982_v17 = vld [vmem:[%s1979_s3 + $0x28] sm:$0xff] }
 0x2d8   :  { %1524 = vmatprep.subr.bf16.mxu0 %v1523_v19 }
 0x2d9   :  { %1391 = vmatmul.mubr.msk.f32.gmra.mrb[10].mxu0 %vm73_vm0, %v1199_v21  ;;  %v746_v21 = vld [vmem:[#allocation4 + $0x68] sm:$0xff] }
 0x2da   :  { %1393 = vmatprep.mubr.msk.f32.mxu0 %vm73_vm0, %v1202_v22  ;;  %v1527_v63 = vpack.c.bf16 %v746_v21, %v745_v18  ;;  %1526 = vmatpush3.bf16.msra.mxu0 %v1523_v19  ;;  %v1539_v18 = vpack.c.bf16 %v982_v17, %v981_v8  ;;  %v983_v19 = vld [vmem:[%s1979_s3 + $0x30] sm:$0xff]  ;;  %v984_v21 = vld [vmem:[%s1979_s3 + $0x38] sm:$0xff] }
 0x2dc   :  { %1528 = vmatprep.subr.bf16.mxu0 %v1527_v63 }
 0x2dd   :  { %1394 = vmatmul.mubr.msk.f32.gmra.mrb[12].mxu0 %vm73_vm0, %v1203_v24 }
 0x2de   :  { %1396 = vmatprep.mubr.msk.f32.mxu0 %vm73_vm0, %v1206_v25  ;;  %1530 = vmatpush3.bf16.msra.mxu0 %v1527_v63  ;;  %v1543_v63 = vpack.c.bf16 %v984_v21, %v983_v19 }
 0x2e1   :  { %1397 = vmatmul.mubr.msk.f32.gmra.mrb[14].mxu0 %vm73_vm0, %v1207_v26 }
 0x337   :  { %v911_v56 = vpop.permute.xlu1 %910 }
 0x3a8   :  { %v1389_v20 = vpop.f32.mrb[8].mxu0 }
 0x3a9   :  { %v559_v22 = vpop.f32.mrb[9].mxu0 }
 0x3aa   :  { %1407 = vmatprep.mubr.msk.f32.mxu1 %vm355_vm2, %v559_v22  ;;  %v985_v22 = vld [vmem:[%s1979_s3 + $0x40] sm:$0xff] }
 0x3ab   :  { %1408 = vmatmul.mubr.msk.f32.vlgmr.msra.gmra.mrb[16].mxu1 %vm355_vm2, %v1389_v20  ;;  %v749_v20 = vsub.s32 3, %v1764_v42 }
 0x3ac   :  { %v1392_v24 = vpop.f32.mrb[10].mxu0  ;;  %1534 = vmatpush3.bf16.msra.mxu1 %v1531_v58  ;;  %v915_v58 = vpop.permute.xlu1 %914 }
 0x3ad   :  { %v569_v23 = vpop.f32.mrb[11].mxu0  ;;  %1536 = vmatprep.subr.bf16.mxu1 %v1535_v62 }
 0x3ae   :  { %1410 = vmatprep.mubr.msk.f32.mxu1 %vm355_vm2, %v569_v23 }
 0x3af   :  { %1411 = vmatmul.mubr.msk.f32.gmra.mrb[18].mxu1 %vm355_vm2, %v1392_v24  ;;  %v986_v24 = vld [vmem:[%s1979_s3 + $0x48] sm:$0xff] }
 0x3b0   :  { %v1395_v25 = vpop.f32.mrb[12].mxu0  ;;  %1538 = vmatpush3.bf16.msra.mxu1 %v1535_v62  ;;  %v1547_v23 = vpack.c.bf16 %v986_v24, %v985_v22 }
 0x3b1   :  { %v579_v26 = vpop.f32.mrb[13].mxu0  ;;  %1540 = vmatprep.subr.bf16.mxu1 %v1539_v18 }
 0x3b2   :  { %1413 = vmatprep.mubr.msk.f32.mxu1 %vm355_vm2, %v579_v26 }
 0x3b3   :  { %1414 = vmatmul.mubr.msk.f32.gmra.mrb[20].mxu1 %vm355_vm2, %v1395_v25  ;;  %v750_v25 = vrot.slane %v1770_v44, %v749_v20 }
 0x3b4   :  { %v1398_v3 = vpop.f32.mrb[14].mxu0  ;;  %1542 = vmatpush3.bf16.msra.mxu1 %v1539_v18 }
 0x3b5   :  { %v589_v5 = vpop.f32.mrb[15].mxu0  ;;  %1544 = vmatprep.subr.bf16.mxu1 %v1543_v63 }
 0x3b6   :  { %1416 = vmatprep.mubr.msk.f32.mxu1 %vm355_vm2, %v589_v5 }
 0x3b7   :  { %1417 = vmatmul.mubr.msk.f32.gmra.mrb[22].mxu1 %vm355_vm2, %v1398_v3 }
 0x3b8   :  { %1546 = vmatpush3.bf16.msra.mxu1 %v1543_v63 }
 0x3b9   :  { %1548 = vmatprep.subr.bf16.mxu1 %v1547_v23 }
 0x3bc   :  { %1550 = vmatpush3.bf16.msra.mxu1 %v1547_v23 }
 0x47e   :  { %v1409_v11 = vpop.f32.mrb[16].mxu1 }
 0x47f   :  { %v702_v12 = vadd.f32 %v1409_v11, %v605_v10  ;;  %v696_v13 = vpop.f32.mrb[17].mxu1 }
 0x480   :  { %v697_v16 = vadd.f32 %v696_v13, %v605_v10 }
 0x481   :  { %v736_v29 = vmax.f32 %v702_v12, 0.0 }
 0x482   :  { %v735_v27 = vmax.f32 %v697_v16, 0.0  ;;  %v1412_v28 = vpop.f32.mrb[18].mxu1 }
 0x483   :  { %v712_v30 = vadd.f32 %v1412_v28, %v605_v10  ;;  %v706_v33 = vpop.f32.mrb[19].mxu1 }
 0x484   :  { %v707_v34 = vadd.f32 %v706_v33, %v605_v10  ;;  %1427 = vmatprep.mubr.msk.f32.mxu0 %vm355_vm2, %v735_v27 }
 0x485   :  { %v738_v35 = vmax.f32 %v712_v30, 0.0  ;;  %1428 = vmatmul.mubr.msk.f32.vlgmr.msra.gmra.mrb[16].mxu0 %vm355_vm2, %v736_v29 }
 0x486   :  { %v737_v36 = vmax.f32 %v707_v34, 0.0  ;;  %v1415_v37 = vpop.f32.mrb[20].mxu1 }
 0x487   :  { %v722_v40 = vadd.f32 %v1415_v37, %v605_v10  ;;  %v716_v41 = vpop.f32.mrb[21].mxu1 }
 0x488   :  { %v717_v43 = vadd.f32 %v716_v41, %v605_v10  ;;  %1430 = vmatprep.mubr.msk.f32.mxu0 %vm355_vm2, %v737_v36 }
 0x489   :  { %v740_v45 = vmax.f32 %v722_v40, 0.0  ;;  %1431 = vmatmul.mubr.msk.f32.gmra.mrb[18].mxu0 %vm355_vm2, %v738_v35 }
 0x48a   :  { %v739_v46 = vmax.f32 %v717_v43, 0.0  ;;  %v1418_v47 = vpop.f32.mrb[22].mxu1 }
 0x48b   :  { %v732_v48 = vadd.f32 %v1418_v47, %v605_v10  ;;  %v726_v49 = vpop.f32.mrb[23].mxu1 }
 0x48c   :  { %v727_v50 = vadd.f32 %v726_v49, %v605_v10  ;;  %1433 = vmatprep.mubr.msk.f32.mxu0 %vm355_vm2, %v739_v46 }
 0x48d   :  { %v742_v51 = vmax.f32 %v732_v48, 0.0  ;;  %1434 = vmatmul.mubr.msk.f32.gmra.mrb[20].mxu0 %vm355_vm2, %v740_v45 }
 0x48e   :  { %v741_v52 = vmax.f32 %v727_v50, 0.0 }
 0x490   :  { %1436 = vmatprep.mubr.msk.f32.mxu0 %vm355_vm2, %v741_v52  ;;  %v907_v52 = vpop.permute.xlu0 %906 }
 0x491   :  { %1437 = vmatmul.mubr.msk.f32.gmra.mrb[22].mxu0 %vm355_vm2, %v742_v51  ;;  %v961_v8 = vsel %vm209_vm1, %v1677_v1, %v907_v52  ;;  %v963_v1 = vsel %vm209_vm1, %v1689_v4, %v911_v56 }
 0x494   :  { %v905_v55 = vpop.permute.xlu0 %904 }
 0x558   :  { %v1429_v26 = vpop.f32.mrb[16].mxu0 }
 0x559   :  { %v847_v3 = vadd.f32 %v1429_v26, %v750_v25  ;;  %v841_v5 = vpop.f32.mrb[17].mxu0 }
 0x55a   :  { %v842_v9 = vadd.f32 %v841_v5, %v750_v25 }
 0x55b   :  { %v881_v10 = vmax.f32 %v847_v3, 0.0 }
 0x55c   :  { %v1432_v11 = vpop.f32.mrb[18].mxu0  ;;  %v880_v13 = vmax.f32 %v842_v9, 0.0 }
 0x55d   :  { %v889_v12 = vadd.f32 %v881_v10, %v1783_v31  ;;  %v851_v16 = vpop.f32.mrb[19].mxu0  ;;  %v857_v33 = vadd.f32 %v1432_v11, %v750_v25 }
 0x55e   :  { %v852_v27 = vadd.f32 %v851_v16, %v750_v25  ;;  %v888_v30 = vadd.f32 %v880_v13, %v1785_v32 }
 0x55f   :  { %938 = vrot.lane.b32.xlu1 %v889_v12, %s1614_s29  ;;  %v883_v40 = vmax.f32 %v857_v33, 0.0 }
 0x560   :  { %v882_v28 = vmax.f32 %v852_v27, 0.0  ;;  %v1435_v29 = vpop.f32.mrb[20].mxu0 }
 0x561   :  { %v861_v34 = vpop.f32.mrb[21].mxu0  ;;  %v867_v41 = vadd.f32 %v1435_v29, %v750_v25 }
 0x562   :  { %v890_v35 = vadd.f32 %v882_v28, %v1793_v39  ;;  %v862_v36 = vadd.f32 %v861_v34, %v750_v25  ;;  %v891_v39 = vadd.f32 %v883_v40, %v1791_v38  ;;  %v909_v38 = vpop.permute.xlu0 %908 }
 0x563   :  { %936 = vrot.lane.b32.xlu1 %v888_v30, %s1614_s29  ;;  %v885_v47 = vmax.f32 %v867_v41, 0.0 }
 0x564   :  { %v884_v37 = vmax.f32 %v862_v36, 0.0  ;;  %940 = vrot.lane.b32.xlu0 %v890_v35, %s1614_s29  ;;  %v1438_v31 = vpop.f32.mrb[22].mxu0 }
 0x565   :  { %v871_v43 = vpop.f32.mrb[23].mxu0  ;;  %v877_v48 = vadd.f32 %v1438_v31, %v750_v25  ;;  %v893_v50 = vadd.f32 %v885_v47, %v1801_v53  ;;  %v960_v53 = vsel %vm209_vm1, %v1672_v0, %v905_v55 }
 0x566   :  { %v892_v45 = vadd.f32 %v884_v37, %v1803_v54  ;;  %v872_v46 = vadd.f32 %v871_v43, %v750_v25  ;;  %v913_v57 = vpop.permute.xlu0 %912  ;;  %v965_v25 = vsel %vm209_vm1, %v1701_v7, %v915_v58  ;;  %v989_v7 = vsub.s32 4, %v1764_v42 }
 0x567   :  { %918 = vrot.lane.b32.xlu1 %v1811_v60, %s1613_s4  ;;  %v887_v54 = vmax.f32 %v877_v48, 0.0 }
 0x568   :  { %v886_v32 = vmax.f32 %v872_v46, 0.0  ;;  %944 = vrot.lane.b32.xlu0 %v892_v45, %s1614_s29 }
 0x569   :  { %v895_v51 = vadd.f32 %v887_v54, %v1811_v60  ;;  %v962_v60 = vsel %vm209_vm1, %v1682_v2, %v909_v38  ;;  %v964_v2 = vsel %vm209_vm1, %v1696_v6, %v913_v57 }
 0x56a   :  { %v894_v49 = vadd.f32 %v886_v32, %v1813_v61  ;;  %v917_v59 = vpop.permute.xlu0 %916 }
 0x56b   :  { %942 = vrot.lane.b32.xlu1 %v891_v39, %s1614_s29  ;;  %v966_v4 = vsel %vm209_vm1, %v1712_v14, %v917_v59  ;;  %v990_v14 = vrot.slane %v1770_v44, %v989_v7 }
 0x56c   :  { %948 = vrot.lane.b32.xlu0 %v894_v49, %s1614_s29 }
 0x56f   :  { %946 = vrot.lane.b32.xlu1 %v893_v50, %s1614_s29 }
 0x573   :  { %950 = vrot.lane.b32.xlu1 %v895_v51, %s1614_s29 }
 0x5d1   :  { %v939_v61 = vpop.permute.xlu1 %938 }
 0x5d2   :  { %v970_v19 = vsel %vm968_vm3, %v961_v8, %v939_v61 }
 0x5d5   :  { %v937_v62 = vpop.permute.xlu1 %936 }
 0x5d6   :  { %v969_v17 = vsel %vm968_vm3, %v960_v53, %v937_v62  ;;  %v941_v18 = vpop.permute.xlu0 %940 }
 0x5d7   :  { %v971_v21 = vsel %vm968_vm3, %v962_v60, %v941_v18  ;;  %1459 = vmatprep.mubr.msk.f32.mxu1 %vm991_vm4, %v969_v17 }
 0x5d8   :  { %1460 = vmatmul.mubr.msk.f32.vlgmr.msra.gmra.mrb[24].mxu1 %vm991_vm4, %v970_v19 }
 0x5d9   :  { %v919_v63 = vpop.permute.xlu1 %918  ;;  %1462 = vmatprep.mubr.msk.f32.mxu1 %vm991_vm4, %v971_v21 }
 0x5da   :  { %v945_v0 = vpop.permute.xlu0 %944  ;;  %v967_v5 = vsel %vm209_vm1, %v1717_v15, %v919_v63 }
 0x5db   :  { %v973_v24 = vsel %vm968_vm3, %v964_v2, %v945_v0 }
 0x5dd   :  { %v943_v20 = vpop.permute.xlu1 %942 }
 0x5de   :  { %v972_v22 = vsel %vm968_vm3, %v963_v1, %v943_v20  ;;  %v949_v23 = vpop.permute.xlu0 %948 }
 0x5df   :  { %1463 = vmatmul.mubr.msk.f32.gmra.mrb[26].mxu1 %vm991_vm4, %v972_v22  ;;  %v975_v6 = vsel %vm968_vm3, %v966_v4, %v949_v23 }
 0x5e0   :  { %1465 = vmatprep.mubr.msk.f32.mxu1 %vm991_vm4, %v973_v24 }
 0x5e1   :  { %v947_v26 = vpop.permute.xlu1 %946 }
 0x5e2   :  { %v974_v3 = vsel %vm968_vm3, %v965_v25, %v947_v26 }
 0x5e3   :  { %1466 = vmatmul.mubr.msk.f32.gmra.mrb[28].mxu1 %vm991_vm4, %v974_v3 }
 0x5e4   :  { %1468 = vmatprep.mubr.msk.f32.mxu1 %vm991_vm4, %v975_v6 }
 0x5e5   :  { %v951_v9 = vpop.permute.xlu1 %950 }
 0x5e6   :  { %v976_v10 = vsel %vm968_vm3, %v967_v5, %v951_v9 }
 0x5e7   :  { %1469 = vmatmul.mubr.msk.f32.gmra.mrb[30].mxu1 %vm991_vm4, %v976_v10 }
 0x6ab   :  { %v1461_v11 = vpop.f32.mrb[24].mxu1 }
 0x6ac   :  { %v1088_v12 = vadd.f32 %v1461_v11, %v990_v14  ;;  %v1082_v13 = vpop.f32.mrb[25].mxu1 }
 0x6ad   :  { %v1083_v16 = vadd.f32 %v1082_v13, %v990_v14 }
 0x6ae   :  { %1123 = vst.msk [vmem:[%s1981_s5 + $0x8] sm:$0xff] %vm1121_vm5, %v1088_v12 }
 0x6af   :  { %1122 = vst.msk [vmem:[%s1981_s5] sm:$0xff] %vm1121_vm5, %v1083_v16 }
 0x6b2   :  { %v1464_v15 = vpop.f32.mrb[26].mxu1 }
 0x6b3   :  { %v1098_v27 = vadd.f32 %v1464_v15, %v990_v14  ;;  %v1092_v42 = vpop.f32.mrb[27].mxu1 }
 0x6b4   :  { %v1093_v28 = vadd.f32 %v1092_v42, %v990_v14 }
 0x6b5   :  { %1125 = vst.msk [vmem:[%s1981_s5 + $0x18] sm:$0xff] %vm1121_vm5, %v1098_v27 }
 0x6b6   :  { %1124 = vst.msk [vmem:[%s1981_s5 + $0x10] sm:$0xff] %vm1121_vm5, %v1093_v28  ;;  %v1467_v44 = vpop.f32.mrb[28].mxu1 }
 0x6b7   :  { %v1108_v29 = vadd.f32 %v1467_v44, %v990_v14  ;;  %v1102_v30 = vpop.f32.mrb[29].mxu1 }
 0x6b8   :  { %v1103_v33 = vadd.f32 %v1102_v30, %v990_v14 }
 0x6b9   :  { %1127 = vst.msk [vmem:[%s1981_s5 + $0x28] sm:$0xff] %vm1121_vm5, %v1108_v29 }
 0x6ba   :  { %1126 = vst.msk [vmem:[%s1981_s5 + $0x20] sm:$0xff] %vm1121_vm5, %v1103_v33  ;;  %v1470_v34 = vpop.f32.mrb[30].mxu1 }
 0x6bb   :  { %v1118_v35 = vadd.f32 %v1470_v34, %v990_v14  ;;  %v1112_v36 = vpop.f32.mrb[31].mxu1 }
 0x6bc   :  { %v1113_v37 = vadd.f32 %v1112_v36, %v990_v14 }
 0x6bd   :  { %1129 = vst.msk [vmem:[%s1981_s5 + $0x38] sm:$0xff] %vm1121_vm5, %v1118_v35 }
 0x6be   :  { %1128 = vst.msk [vmem:[%s1981_s5 + $0x30] sm:$0xff] %vm1121_vm5, %v1113_v37 }
 0x6bf   :  { %1134 = vsyncpa [#allocation3], 1 }
 0x6c0   :  { %1135 = vsyncpa [#allocation5], 1 }

</bundles_post_ra>
